<compile_context>
chip_gen: v5e
topology: v5e:2x2
jax: 0.10.0
libtpu: 0.0.40
codegen_flags: <defaults>
</compile_context>

<pallas_src>
import math

import jax
import jax.numpy as jnp
from jax.experimental import pallas as pl
from jax.experimental.pallas import tpu as pltpu

_LANE = 128
_SUBLANE = 8


def make_pos_enc(embed_dim: int, max_seq_len: int) -> jnp.ndarray:
    """Deterministic sinusoidal positional encoding, identical to the PyTorch init."""
    position = jnp.arange(0, max_seq_len, dtype=jnp.float32)[:, None]           # (L, 1)
    div_term = jnp.exp(
        jnp.arange(0, embed_dim, 2, dtype=jnp.float32)
        * -(math.log(10000.0) / embed_dim)
    )                                                                            # (E/2,)
    sin = jnp.sin(position * div_term)                                           # (L, E/2)
    cos = jnp.cos(position * div_term)                                           # (L, E/2)
    # interleave: even columns = sin, odd columns = cos (matches 0::2 / 1::2)
    pe = jnp.stack([sin, cos], axis=-1).reshape(max_seq_len, embed_dim)          # (L, E)
    return pe[None, :, :]                                                        # (1, L, E)


def _add_pos_kernel(x_ref, pe_ref, o_ref):
    # x_ref: (TB, TL); pe_ref: (1, TL) broadcast over the batch/sublane axis.
    o_ref[...] = (x_ref[...] + pe_ref[...]).astype(o_ref.dtype)


def _choose_tiles(B: int, L: int, itemsize: int):
    """Pick (batch_tile, lane_tile) obeying the (8, 128) rule with ~2 MiB x-blocks."""
    budget_elems = (2 * 1024 * 1024) // itemsize  # elements of x per block

    # Lane (minor) tile: a multiple of 128, or the full extent when L < 128.
    if L >= _LANE:
        cap = max(_LANE, (budget_elems // _SUBLANE) // _LANE * _LANE)
        tl = min((L // _LANE) * _LANE, cap)
    else:
        tl = L

    # Batch (sublane) tile: a multiple of 8, or the full extent when B < 8.
    max_tb = max(1, budget_elems // max(tl, 1))
    if B >= _SUBLANE:
        tb = min((B // _SUBLANE) * _SUBLANE, max(_SUBLANE, (max_tb // _SUBLANE) * _SUBLANE))
    else:
        tb = B
    return tb, tl


def _positional_encoding_pallas(x: jnp.ndarray, pos_enc: jnp.ndarray) -> jnp.ndarray:
    """x: (B, S, E); pos_enc: (1, max_seq_len, E). Returns x + pos_enc[:, :S]."""
    B, S, E = x.shape
    L = S * E
    pe = jax.lax.slice_in_dim(pos_enc, 0, S, axis=1)                             # (1, S, E)

    # Lane-dense layout: flatten (S, E) into one row of S*E.
    x2d = x.reshape(B, L)
    pe2d = pe.reshape(1, L)

    tb, tl = _choose_tiles(B, L, x2d.dtype.itemsize)
    grid = (pl.cdiv(B, tb), pl.cdiv(L, tl))

    out2d = pl.pallas_call(
        _add_pos_kernel,
        out_shape=jax.ShapeDtypeStruct((B, L), x.dtype),
        grid_spec=pltpu.PrefetchScalarGridSpec(
            num_scalar_prefetch=0,
            grid=grid,
            in_specs=[
                pl.BlockSpec((tb, tl), lambda i, j: (i, j)),   # x tile
                pl.BlockSpec((1, tl), lambda i, j: (0, j)),    # shared pe row (bcast over batch)
            ],
            out_specs=pl.BlockSpec((tb, tl), lambda i, j: (i, j)),
        ),
        compiler_params=pltpu.CompilerParams(
            dimension_semantics=("parallel", "parallel"),
        ),
        input_output_aliases={0: 0},  # donate x -> in-place add when caller allows it
    )(x2d, pe2d)
    return out2d.reshape(B, S, E)


def positional_encoding_forward(
    x: jnp.ndarray, pos_enc: jnp.ndarray, *, min_pallas_bytes: int = 1 << 20
) -> jnp.ndarray:
    """Public wrapper: tiny tensors use XLA's fused add, bigger ones the Pallas kernel."""
    if x.size * x.dtype.itemsize < min_pallas_bytes:
        pe = jax.lax.slice_in_dim(pos_enc, 0, x.shape[1], axis=1)
        return (x + pe).astype(x.dtype)
    return _positional_encoding_pallas(x, pos_enc)


if __name__ == "__main__":
    # Small shapes consistent with the module: embed_dim=32, max_seq_len=16,
    # input batch=2, seq=8 (forward slices pos_enc to the input's seq length).
    embed_dim = 32
    max_seq_len = 16
    B, S = 2, 8

    key = jax.random.PRNGKey(0)
    x = jax.random.normal(key, (B, S, embed_dim), dtype=jnp.float32)
    pos_enc = make_pos_enc(embed_dim, max_seq_len)

    # Reference (plain JAX, same semantics as the PyTorch forward), computed first.
    ref = x + pos_enc[:, :S, :]

    # Exercise the Pallas path directly (the dispatching wrapper would route
    # this tiny demo input to the plain-JAX add).
    out = _positional_encoding_pallas(x, pos_enc)
    out = jax.block_until_ready(out)

    assert out.shape == (B, S, embed_dim)
    assert jnp.allclose(out, ref, atol=1e-6), "Pallas kernel mismatch vs reference"

    # The size-gated public wrapper must agree as well.
    out2 = jax.block_until_ready(positional_encoding_forward(x, pos_enc))
    assert jnp.allclose(out2, ref, atol=1e-6), "wrapper mismatch vs reference"

    print("KERNEL_OK")
</pallas_src>

<mosaic_0001>
module attributes {stable_mosaic.version = 11 : i64} {
  func.func @_add_pos_kernel(%arg0: i32, %arg1: i32, %arg2: memref<2x256xf32, #tpu.memory_space<vmem>>, %arg3: memref<1x256xf32, #tpu.memory_space<vmem>>, %arg4: memref<2x256xf32, #tpu.memory_space<vmem>>) attributes {dimension_semantics = [#tpu.dimension_semantics<parallel>, #tpu.dimension_semantics<parallel>], iteration_bounds = array<i64: 1, 1>, scalar_prefetch = 0 : i64, scratch_operands = 0 : i64, tpu.core_type = #tpu.core_type<tc>, window_params = [{transform_indices = @transform_0, window_bounds = array<i64: 2, 256>}, {transform_indices = @transform_1, window_bounds = array<i64: 1, 256>}, {transform_indices = @transform_2, window_bounds = array<i64: 2, 256>}]} {
    %c0 = arith.constant 0 : index
    %c0_0 = arith.constant 0 : index
    %0 = vector.load %arg2[%c0, %c0_0] : memref<2x256xf32, #tpu.memory_space<vmem>>, vector<2x256xf32>
    %c0_1 = arith.constant 0 : index
    %c0_2 = arith.constant 0 : index
    %1 = vector.load %arg3[%c0_1, %c0_2] : memref<1x256xf32, #tpu.memory_space<vmem>>, vector<1x256xf32>
    %2 = vector.broadcast %1 : vector<1x256xf32> to vector<2x256xf32>
    %3 = arith.addf %0, %2 : vector<2x256xf32>
    %c0_3 = arith.constant 0 : index
    %c0_4 = arith.constant 0 : index
    %4 = vector.load %arg4[%c0_3, %c0_4] : memref<2x256xf32, #tpu.memory_space<vmem>>, vector<2x256xf32>
    tpu.vector_store %arg4[%c0_3, %c0_4], %3 {strides = array<i32>} : memref<2x256xf32, #tpu.memory_space<vmem>>, vector<2x256xf32>,
    return
  }
  func.func @transform_0(%arg0: i32, %arg1: i32) -> (i32, i32) {
    %c0_i32 = arith.constant 0 : i32
    return %arg0, %arg1 : i32, i32
  }
  func.func @transform_1(%arg0: i32, %arg1: i32) -> (i32, i32) {
    %c0_i32 = arith.constant 0 : i32
    %c0_i32_0 = arith.constant 0 : i32
    return %c0_i32, %arg1 : i32, i32
  }
  func.func @transform_2(%arg0: i32, %arg1: i32) -> (i32, i32) {
    %c0_i32 = arith.constant 0 : i32
    return %arg0, %arg1 : i32, i32
  }
}

</mosaic_0001>

<bundles_post_ra>
// kernel: tpu_custom_call.1
= control target key start
LH: loop header
LB: loop body
LE: loop exit
PB: predicated region body
PF: predicated region fallthrough
CT: control target
= control target key end

     0   :  { %7 = vsyncpa [#allocation3], 0  ;;  %s134_s0 = inlined_call_operand.hbm [shape: f32[2,256], index: 0, kind: input, shape index: {}, may-alias: {0,2}]   ;;  %s135_s1 = inlined_call_operand.vmem [shape: f32[1,256], index: 1, kind: input, shape index: {}]   ;;  %s136_s2 = inlined_call_operand.hbm [shape: f32[2,256], index: 2, kind: output, shape index: {}, may-alias: {0,2}]  }
   0x1   :  { %8 = vsyncpa [#allocation4], 0  ;;  %s14_s11 = sshll.u32 %s134_s0, 4  ;;  %s108_s12 = smov [#allocation2]   ;;  %s15_s11 = int_to_ptr.hbm [resolvable:$true] %s14_s11 }
   0x2   :  { %s16_s13 = sshll.u32 %s108_s12, 4  ;;  %s17_s13 = int_to_ptr.vmem [resolvable:$true] %s16_s13 }
   0x3   :  { %19 = dma.hbm_to_vmem [thread:$0]  %s15_s11, 64, %s17_s13, [#allocation3]  }
   0x4   :  { %104 = dma.done.wait [#allocation3], 64  }
   0x5   :  { %105 = vsyncadd [#allocation3], 4294967232  ;;  %v27_v0 = vld [vmem:[%s135_s1] sm:$0x3]  ;;  %vm32_vm0 = vcmask 1041408   ;;  %s109_s16 = smov [#allocation5]  }
   0x6   :  { %v29_v1 = vperm.slane %v27_v0, 0  ;;  %v30_v2 = vperm.slane %v27_v0, 1  ;;  %v26_v3 = vld [vmem:[#allocation2] sm:$0xf]  ;;  %s42_s17 = sshll.u32 %s109_s16, 4  ;;  %s44_s19 = sshll.u32 %s136_s2, 4  ;;  %s43_s17 = int_to_ptr.vmem [resolvable:$true] %s42_s17  ;;  %s45_s19 = int_to_ptr.hbm [resolvable:$true] %s44_s19 }
   0x8   :  { %v31_v4 = vrot.slane %v30_v2, 6 }
   0xa   :  { %v33_v5 = vsel %vm32_vm0, %v29_v1, %v31_v4 }
   0xb   :  { %v35_v6 = vadd.f32 %v33_v5, %v26_v3 }
   0xd   :  { %36 = vst [vmem:[#allocation5] sm:$0xf] %v35_v6 }
   0xe   :  { %47 = dma.vmem_to_hbm [thread:$0]  %s43_s17, 64, %s45_s19, [#allocation4]  }
   0xf   :  { %106 = dma.done.wait [#allocation4], 64  }
  0x10   :  { %107 = vsyncadd [#allocation4], 4294967232 }
  0x11   :  { %52 = vsyncpa [#allocation3], 1 }
  0x12   :  { %53 = vsyncpa [#allocation4], 1 }

</bundles_post_ra>
